<compile_context>
chip_gen: v7x
topology: tpu7x:2x2x1
jax: 0.10.0
libtpu: 0.0.40
codegen_flags: <defaults>
</compile_context>

<pallas_src>
import jax
import jax.numpy as jnp
from jax.experimental import pallas as pl
from jax.experimental.pallas import tpu as pltpu


def _round_up(n, m):
    return ((n + m - 1) // m) * m


def _choose_tile(batch, tile_b):
    """Sublane-aligned batch tile, <= batch, balanced across >=2 tiles for large B."""
    if batch <= 8:
        return batch
    tb = min(tile_b, (batch // 8) * 8)          # multiple of 8, never exceeds batch
    n = pl.cdiv(batch, tb)
    if batch > 512 and n < 2:                   # v7x megacore: avoid a 1-step grid
        n = 2
    # Rebalance: smallest sublane-aligned tile that still covers batch in n tiles.
    tb = min(tb, _round_up(pl.cdiv(batch, n), 8))
    return tb


def _mlp_kernel(x_ref, w1_ref, b1_ref, w2_ref, b2_ref, o_ref):
    # x: [tb, 784], w1: [784, 10], b1: [1, 10], w2: [1, 10], b2: [1, 1], o: [1, tb]
    x = x_ref[...]
    # Layer 1 on the MXU with f32 accumulation.
    h = jnp.dot(x, w1_ref[...], preferred_element_type=jnp.float32)   # [tb, 10]
    h = jnp.maximum(h + b1_ref[...], 0.0)                             # ReLU
    # Layer 2 on VPU (broadcast mul) + XLU (10-wide lane reduce): a second MXU
    # matmul with N=1 would waste >90% of the output lanes for no gain.
    y = jnp.sum(h * w2_ref[...], axis=-1)                             # [tb]
    # Lane-dense store: present the per-row results along the lane axis.
    y = y.reshape(1, -1) + b2_ref[...]                                # [1, tb]
    o_ref[...] = y.astype(o_ref.dtype)


def net_forward(x, w1, b1, w2, b2, *, tile_b=2048):
    """x: [B, 784] f32, w1: [784, 10], b1: [1, 10], w2: [10, 1], b2: [1, 1]
    -> [B, 1] f32 (same math as the PyTorch module's forward)."""
    B, F_in = x.shape
    H = w1.shape[1]
    w2_row = jnp.reshape(w2, (1, H))            # row vector for the VPU second layer

    tb = _choose_tile(B, tile_b)
    num_tiles = pl.cdiv(B, tb)

    out_tiles = pl.pallas_call(
        _mlp_kernel,
        out_shape=jax.ShapeDtypeStruct((num_tiles, tb), jnp.float32),
        grid=(num_tiles,),
        in_specs=[
            # x: one batch tile per grid step; edge block is clamped by Pallas
            # (no padded copy of x in HBM). Double-buffered by the pipeline.
            pl.BlockSpec((tb, F_in), lambda i: (i, 0)),
            # Weights / biases: constant block index -> fetched once, VMEM-resident.
            pl.BlockSpec((F_in, H), lambda i: (0, 0)),
            pl.BlockSpec((1, H), lambda i: (0, 0)),
            pl.BlockSpec((1, H), lambda i: (0, 0)),
            pl.BlockSpec((1, 1), lambda i: (0, 0)),
        ],
        # Lane-dense output: one (1, tb) row per tile (unmasked vst, tiny buffer).
        out_specs=pl.BlockSpec((1, tb), lambda i: (i, 0)),
        compiler_params=pltpu.CompilerParams(
            # Batch tiles are independent -> shard across TensorCores on v7x.
            dimension_semantics=("parallel",),
            # Allow tb=2048-4096 double-buffered x tiles on every generation
            # (v5e default scoped VMEM is only 16 MiB); stays under v7x's 64 MiB/TC.
            vmem_limit_bytes=48 * 1024 * 1024,
        ),
        cost_estimate=pl.CostEstimate(
            flops=2 * B * F_in * H + 3 * B * H,
            transcendentals=0,
            bytes_accessed=B * F_in * 4 + F_in * H * 4 + H * 8 + 4
            + num_tiles * tb * 4,
        ),
    )(x, w1, b1, w2_row, b2)

    # Tail rows (>= B) of the last tile are garbage computed from the clamped
    # edge block; they are dropped here and never participate in any reduction.
    return out_tiles.reshape(num_tiles * tb)[:B].reshape(B, 1)


def init_params(key):
    """Deterministic init matching the PyTorch module's shapes.

    PyTorch nn.Linear default init: U(-1/sqrt(fan_in), 1/sqrt(fan_in)).
    """
    k1, k2, k3, k4 = jax.random.split(key, 4)
    bound1 = 1.0 / jnp.sqrt(784.0)
    bound2 = 1.0 / jnp.sqrt(10.0)
    w1 = jax.random.uniform(k1, (784, 10), jnp.float32, -bound1, bound1)
    b1 = jax.random.uniform(k2, (1, 10), jnp.float32, -bound1, bound1)
    w2 = jax.random.uniform(k3, (10, 1), jnp.float32, -bound2, bound2)
    b2 = jax.random.uniform(k4, (1, 1), jnp.float32, -bound2, bound2)
    return w1, b1, w2, b2


def _reference(x, w1, b1, w2, b2):
    return jnp.maximum(x @ w1 + b1, 0.0) @ w2 + b2


if __name__ == "__main__":
    key = jax.random.PRNGKey(0)
    k_x, k_p = jax.random.split(key)
    w1, b1, w2, b2 = init_params(k_p)

    # 1) Small batch: single full tile (tb == B).
    B = 8
    x = jax.random.normal(k_x, (B, 784), jnp.float32)
    out = jax.block_until_ready(net_forward(x, w1, b1, w2, b2))
    ref = _reference(x, w1, b1, w2, b2)
    assert out.shape == (B, 1)
    assert jnp.allclose(out, ref, atol=1e-5, rtol=1e-5)

    # 2) Non-multiple batch with a tiny tile: multiple grid steps, constant-index
    #    weight reuse, clamped edge block (no jnp.pad), tail rows dropped.
    B2 = 20
    x2 = jax.random.normal(jax.random.PRNGKey(1), (B2, 784), jnp.float32)
    out2 = jax.block_until_ready(net_forward(x2, w1, b1, w2, b2, tile_b=8))
    ref2 = _reference(x2, w1, b1, w2, b2)
    assert out2.shape == (B2, 1)
    assert jnp.allclose(out2, ref2, atol=1e-5, rtol=1e-5)

    # 3) Same non-multiple batch through the default tile-selection path
    #    (tb=16, 2 tiles, partial last x block).
    out3 = jax.block_until_ready(net_forward(x2, w1, b1, w2, b2))
    assert out3.shape == (B2, 1)
    assert jnp.allclose(out3, ref2, atol=1e-5, rtol=1e-5)

    print("KERNEL_OK")
</pallas_src>

<mosaic_0001>
module attributes {stable_mosaic.version = 11 : i64} {
  func.func @_mlp_kernel(%arg0: i32, %arg1: memref<8x784xf32, #tpu.memory_space<vmem>>, %arg2: memref<784x10xf32, #tpu.memory_space<vmem>>, %arg3: memref<1x10xf32, #tpu.memory_space<vmem>>, %arg4: memref<1x10xf32, #tpu.memory_space<vmem>>, %arg5: memref<1x1xf32, #tpu.memory_space<vmem>>, %arg6: memref<1x8xf32, #tpu.memory_space<vmem>>) attributes {dimension_semantics = [#tpu.dimension_semantics<parallel>], iteration_bounds = array<i64: 1>, scalar_prefetch = 0 : i64, scratch_operands = 0 : i64, tpu.core_type = #tpu.core_type<tc>, window_params = [{transform_indices = @transform_0, window_bounds = array<i64: 8, 784>}, {pipeline_mode = #tpu.pipeline_mode<synchronous>, transform_indices = @transform_1, window_bounds = array<i64: 784, 10>}, {pipeline_mode = #tpu.pipeline_mode<synchronous>, transform_indices = @transform_2, window_bounds = array<i64: 1, 10>}, {pipeline_mode = #tpu.pipeline_mode<synchronous>, transform_indices = @transform_3, window_bounds = array<i64: 1, 10>}, {pipeline_mode = #tpu.pipeline_mode<synchronous>, transform_indices = @transform_4, window_bounds = array<i64: 1, 1>}, {transform_indices = @transform_5, window_bounds = array<i64: 1, 8>}]} {
    %c0 = arith.constant 0 : index
    %c0_0 = arith.constant 0 : index
    %0 = vector.load %arg1[%c0, %c0_0] : memref<8x784xf32, #tpu.memory_space<vmem>>, vector<8x784xf32>
    %c0_1 = arith.constant 0 : index
    %c0_2 = arith.constant 0 : index
    %1 = vector.load %arg2[%c0_1, %c0_2] : memref<784x10xf32, #tpu.memory_space<vmem>>, vector<784x10xf32>
    %cst = arith.constant dense<0.000000e+00> : vector<8x10xf32>
    %2 = tpu.matmul %0, %1, %cst {dimension_numbers = #tpu.dot_dimension_numbers<[1], [0], [0], [1], [0, 0, 1, 1], [], []>} : vector<8x784xf32>, vector<784x10xf32>, vector<8x10xf32> -> vector<8x10xf32>
    %c0_3 = arith.constant 0 : index
    %c0_4 = arith.constant 0 : index
    %3 = vector.load %arg3[%c0_3, %c0_4] : memref<1x10xf32, #tpu.memory_space<vmem>>, vector<1x10xf32>
    %4 = vector.broadcast %3 : vector<1x10xf32> to vector<8x10xf32>
    %5 = arith.addf %2, %4 : vector<8x10xf32>
    %cst_5 = arith.constant 0.000000e+00 : f32
    %6 = vector.broadcast %cst_5 : f32 to vector<8x10xf32>
    %7 = arith.maximumf %5, %6 : vector<8x10xf32>
    %c0_6 = arith.constant 0 : index
    %c0_7 = arith.constant 0 : index
    %8 = vector.load %arg4[%c0_6, %c0_7] : memref<1x10xf32, #tpu.memory_space<vmem>>, vector<1x10xf32>
    %9 = vector.broadcast %8 : vector<1x10xf32> to vector<8x10xf32>
    %10 = arith.mulf %7, %9 : vector<8x10xf32>
    %cst_8 = arith.constant dense<0.000000e+00> : vector<8xf32>
    %11 = vector.multi_reduction <add>, %10, %cst_8 [1] : vector<8x10xf32> to vector<8xf32>
    %12 = vector.shape_cast %11 : vector<8xf32> to vector<1x8xf32>
    %c0_9 = arith.constant 0 : index
    %c0_10 = arith.constant 0 : index
    %13 = vector.load %arg5[%c0_9, %c0_10] : memref<1x1xf32, #tpu.memory_space<vmem>>, vector<1x1xf32>
    %14 = vector.broadcast %13 : vector<1x1xf32> to vector<1x8xf32>
    %15 = arith.addf %12, %14 : vector<1x8xf32>
    %c0_11 = arith.constant 0 : index
    %c0_12 = arith.constant 0 : index
    %16 = vector.load %arg6[%c0_11, %c0_12] : memref<1x8xf32, #tpu.memory_space<vmem>>, vector<1x8xf32>
    tpu.vector_store %arg6[%c0_11, %c0_12], %15 {strides = array<i32>} : memref<1x8xf32, #tpu.memory_space<vmem>>, vector<1x8xf32>,
    return
  }
  func.func @transform_0(%arg0: i32) -> (i32, i32) {
    %c0_i32 = arith.constant 0 : i32
    %c0_i32_0 = arith.constant 0 : i32
    return %arg0, %c0_i32 : i32, i32
  }
  func.func @transform_1(%arg0: i32) -> (i32, i32) {
    %c0_i32 = arith.constant 0 : i32
    %c0_i32_0 = arith.constant 0 : i32
    %c0_i32_1 = arith.constant 0 : i32
    return %c0_i32, %c0_i32_0 : i32, i32
  }
  func.func @transform_2(%arg0: i32) -> (i32, i32) {
    %c0_i32 = arith.constant 0 : i32
    %c0_i32_0 = arith.constant 0 : i32
    %c0_i32_1 = arith.constant 0 : i32
    return %c0_i32, %c0_i32_0 : i32, i32
  }
  func.func @transform_3(%arg0: i32) -> (i32, i32) {
    %c0_i32 = arith.constant 0 : i32
    %c0_i32_0 = arith.constant 0 : i32
    %c0_i32_1 = arith.constant 0 : i32
    return %c0_i32, %c0_i32_0 : i32, i32
  }
  func.func @transform_4(%arg0: i32) -> (i32, i32) {
    %c0_i32 = arith.constant 0 : i32
    %c0_i32_0 = arith.constant 0 : i32
    %c0_i32_1 = arith.constant 0 : i32
    return %c0_i32, %c0_i32_0 : i32, i32
  }
  func.func @transform_5(%arg0: i32) -> (i32, i32) {
    %c0_i32 = arith.constant 0 : i32
    %c0_i32_0 = arith.constant 0 : i32
    return %arg0, %c0_i32 : i32, i32
  }
}

</mosaic_0001>

<bundles_post_ra>
// kernel: tpu_custom_call.1
= control target key start
LH: loop header
LB: loop body
LE: loop exit
PB: predicated region body
PF: predicated region fallthrough
CT: control target
= control target key end

     0   :  { %s1085_s0 = inlined_call_operand.vmem [shape: f32[8,784], index: 0, kind: input, shape index: {}]   ;;  %s1086_s1 = inlined_call_operand.vmem [shape: f32[784,10], index: 1, kind: input, shape index: {}]   ;;  %s1087_s2 = inlined_call_operand.vmem [shape: f32[1,10], index: 2, kind: input, shape index: {}]   ;;  %s1088_s3 = inlined_call_operand.vmem [shape: f32[1,10], index: 3, kind: input, shape index: {}]   ;;  %s1089_s4 = inlined_call_operand.<no memory space> [shape: f32[1,1], index: 4, kind: input, shape index: {}]   ;;  %s1090_s5 = inlined_call_operand.hbm [shape: f32[1,8], index: 5, kind: output, shape index: {}]  }
   0x1   :  { %v10_v0 = vstv %s1089_s4 }
   0x2   :  { %11 = vst [vmem:[#allocation2] sm:$0x1] %v10_v0 }
   0x3   :  { %v46_v1 = vld [vmem:[%s1086_s1 + $0x80] sm:$0xff]  ;;  %v47_v2 = vld [vmem:[%s1086_s1 + $0x88] sm:$0xff]  ;;  %v48_v12 = vld [vmem:[%s1086_s1 + $0x90] sm:$0xff] }
   0x4   :  { %v30_v3 = vld [vmem:[%s1086_s1] sm:$0xff]  ;;  %v585_v4 = vpack.c.bf16 %v47_v2, %v46_v1  ;;  %v31_v5 = vld [vmem:[%s1086_s1 + $0x8] sm:$0xff]  ;;  %v49_v14 = vld [vmem:[%s1086_s1 + $0x98] sm:$0xff] }
   0x5   :  { %v78_v6 = vld [vmem:[%s1086_s1 + $0x180] sm:$0xff]  ;;  %v79_v7 = vld [vmem:[%s1086_s1 + $0x188] sm:$0xff]  ;;  %v587_v8 = vpack.c.bf16 %v31_v5, %v30_v3  ;;  %v32_v15 = vld [vmem:[%s1086_s1 + $0x10] sm:$0xff]  ;;  %v589_v17 = vpack.c.bf16 %v49_v14, %v48_v12 }
   0x6   :  { %v617_v9 = vpack.c.bf16 %v79_v7, %v78_v6  ;;  %v62_v10 = vld [vmem:[%s1086_s1 + $0x100] sm:$0xff]  ;;  %v63_v11 = vld [vmem:[%s1086_s1 + $0x108] sm:$0xff]  ;;  %586 = vmatprep.subr.bf16.mxu0 %v585_v4  ;;  %v33_v16 = vld [vmem:[%s1086_s1 + $0x18] sm:$0xff] }
   0x7   :  { %v619_v13 = vpack.c.bf16 %v63_v11, %v62_v10  ;;  %588 = vmatpush3.bf16.msra.mxu0 %v587_v8  ;;  %v591_v18 = vpack.c.bf16 %v33_v16, %v32_v15  ;;  %v80_v19 = vld [vmem:[%s1086_s1 + $0x190] sm:$0xff]  ;;  %v81_v20 = vld [vmem:[%s1086_s1 + $0x198] sm:$0xff]  ;;  %v50_v24 = vld [vmem:[%s1086_s1 + $0xa0] sm:$0xff] }
   0x8   :  { %618 = vmatprep.subr.bf16.mxu1 %v617_v9  ;;  %v64_v21 = vld [vmem:[%s1086_s1 + $0x110] sm:$0xff]  ;;  %v621_v22 = vpack.c.bf16 %v81_v20, %v80_v19  ;;  %v65_v23 = vld [vmem:[%s1086_s1 + $0x118] sm:$0xff]  ;;  %v51_v25 = vld [vmem:[%s1086_s1 + $0xa8] sm:$0xff]  ;;  %590 = vmatprep.subr.bf16.mxu0 %v589_v17 }
   0x9   :  { %620 = vmatpush3.bf16.msra.mxu1 %v619_v13  ;;  %v623_v26 = vpack.c.bf16 %v65_v23, %v64_v21  ;;  %v593_v27 = vpack.c.bf16 %v51_v25, %v50_v24  ;;  %v34_v28 = vld [vmem:[%s1086_s1 + $0x20] sm:$0xff]  ;;  %v35_v29 = vld [vmem:[%s1086_s1 + $0x28] sm:$0xff]  ;;  %v52_v36 = vld [vmem:[%s1086_s1 + $0xb0] sm:$0xff] }
   0xa   :  { %v82_v30 = vld [vmem:[%s1086_s1 + $0x1a0] sm:$0xff]  ;;  %622 = vmatprep.subr.bf16.mxu1 %v621_v22  ;;  %v83_v31 = vld [vmem:[%s1086_s1 + $0x1a8] sm:$0xff]  ;;  %v595_v34 = vpack.c.bf16 %v35_v29, %v34_v28  ;;  %v53_v37 = vld [vmem:[%s1086_s1 + $0xb8] sm:$0xff] }
   0xb   :  { %v66_v32 = vld [vmem:[%s1086_s1 + $0x120] sm:$0xff]  ;;  %v67_v33 = vld [vmem:[%s1086_s1 + $0x128] sm:$0xff]  ;;  %592 = vmatpush3.bf16.msra.mxu0 %v591_v18  ;;  %v625_v35 = vpack.c.bf16 %v83_v31, %v82_v30  ;;  %v36_v38 = vld [vmem:[%s1086_s1 + $0x30] sm:$0xff]  ;;  %v597_v40 = vpack.c.bf16 %v53_v37, %v52_v36 }
   0xc   :  { %594 = vmatprep.subr.bf16.mxu0 %v593_v27  ;;  %v627_v39 = vpack.c.bf16 %v67_v33, %v66_v32  ;;  %v37_v41 = vld [vmem:[%s1086_s1 + $0x38] sm:$0xff]  ;;  %v84_v42 = vld [vmem:[%s1086_s1 + $0x1b0] sm:$0xff]  ;;  %v54_v47 = vld [vmem:[%s1086_s1 + $0xc0] sm:$0xff] }
   0xd   :  { %624 = vmatpush3.bf16.msra.mxu1 %v623_v26  ;;  %v85_v43 = vld [vmem:[%s1086_s1 + $0x1b8] sm:$0xff]  ;;  %v68_v45 = vld [vmem:[%s1086_s1 + $0x130] sm:$0xff]  ;;  %v55_v48 = vld [vmem:[%s1086_s1 + $0xc8] sm:$0xff]  ;;  %v599_v49 = vpack.c.bf16 %v37_v41, %v36_v38 }
   0xe   :  { %626 = vmatprep.subr.bf16.mxu1 %v625_v35  ;;  %v629_v44 = vpack.c.bf16 %v85_v43, %v84_v42  ;;  %v69_v46 = vld [vmem:[%s1086_s1 + $0x138] sm:$0xff]  ;;  %v86_v50 = vld [vmem:[%s1086_s1 + $0x1c0] sm:$0xff]  ;;  %v87_v51 = vld [vmem:[%s1086_s1 + $0x1c8] sm:$0xff]  ;;  %v601_v53 = vpack.c.bf16 %v55_v48, %v54_v47 }
   0xf   :  { %596 = vmatpush3.bf16.msra.mxu0 %v595_v34  ;;  %v631_v52 = vpack.c.bf16 %v69_v46, %v68_v45  ;;  %v38_v54 = vld [vmem:[%s1086_s1 + $0x40] sm:$0xff]  ;;  %v39_v55 = vld [vmem:[%s1086_s1 + $0x48] sm:$0xff]  ;;  %v633_v57 = vpack.c.bf16 %v87_v51, %v86_v50  ;;  %v56_v59 = vld [vmem:[%s1086_s1 + $0xd0] sm:$0xff]  ;;  %v714_v51 = vmov 0.0|0.0  }
  0x10   :  { %598 = vmatprep.subr.bf16.mxu0 %v597_v40  ;;  %v70_v56 = vld [vmem:[%s1086_s1 + $0x140] sm:$0xff]  ;;  %v71_v58 = vld [vmem:[%s1086_s1 + $0x148] sm:$0xff]  ;;  %v57_v60 = vld [vmem:[%s1086_s1 + $0xd8] sm:$0xff]  ;;  %v603_v63 = vpack.c.bf16 %v39_v55, %v38_v54 }
  0x11   :  { %628 = vmatpush3.bf16.msra.mxu1 %v627_v39  ;;  %v88_v61 = vld [vmem:[%s1086_s1 + $0x1d0] sm:$0xff]  ;;  %v89_v62 = vld [vmem:[%s1086_s1 + $0x1d8] sm:$0xff]  ;;  %v635_v0 = vpack.c.bf16 %v71_v58, %v70_v56  ;;  %v605_v1 = vpack.c.bf16 %v57_v60, %v56_v59  ;;  %v58_v7 = vld [vmem:[%s1086_s1 + $0xe0] sm:$0xff] }
  0x12   :  { %630 = vmatprep.subr.bf16.mxu1 %v629_v44  ;;  %v40_v2 = vld [vmem:[%s1086_s1 + $0x50] sm:$0xff]  ;;  %v41_v3 = vld [vmem:[%s1086_s1 + $0x58] sm:$0xff]  ;;  %v637_v5 = vpack.c.bf16 %v89_v62, %v88_v61  ;;  %v59_v8 = vld [vmem:[%s1086_s1 + $0xe8] sm:$0xff] }
  0x13   :  { %600 = vmatpush3.bf16.msra.mxu0 %v599_v49  ;;  %v72_v4 = vld [vmem:[%s1086_s1 + $0x150] sm:$0xff]  ;;  %v73_v6 = vld [vmem:[%s1086_s1 + $0x158] sm:$0xff]  ;;  %v90_v9 = vld [vmem:[%s1086_s1 + $0x1e0] sm:$0xff]  ;;  %v607_v11 = vpack.c.bf16 %v41_v3, %v40_v2  ;;  %v609_v15 = vpack.c.bf16 %v59_v8, %v58_v7 }
  0x14   :  { %602 = vmatprep.subr.bf16.mxu0 %v601_v53  ;;  %v91_v10 = vld [vmem:[%s1086_s1 + $0x1e8] sm:$0xff]  ;;  %v42_v12 = vld [vmem:[%s1086_s1 + $0x60] sm:$0xff]  ;;  %v639_v14 = vpack.c.bf16 %v73_v6, %v72_v4  ;;  %v60_v20 = vld [vmem:[%s1086_s1 + $0xf0] sm:$0xff] }
  0x15   :  { %632 = vmatpush3.bf16.msra.mxu1 %v631_v52  ;;  %v24_v13 = vld [vmem:[%s1085_s0 + $0x8] sm:$0xff]  ;;  %v74_v17 = vld [vmem:[%s1086_s1 + $0x160] sm:$0xff]  ;;  %v641_v19 = vpack.c.bf16 %v91_v10, %v90_v9  ;;  %v61_v21 = vld [vmem:[%s1086_s1 + $0xf8] sm:$0xff] }
  0x16   :  { %634 = vmatprep.subr.bf16.mxu1 %v633_v57  ;;  %v43_v16 = vld [vmem:[%s1086_s1 + $0x68] sm:$0xff]  ;;  %203 = vmatprep.mubr.f32.mxu0 %v24_v13  ;;  %v26_v22 = vld [vmem:[%s1085_s0 + $0x18] sm:$0xff]  ;;  %v92_v23 = vld [vmem:[%s1086_s1 + $0x1f0] sm:$0xff]  ;;  %v613_v27 = vpack.c.bf16 %v61_v21, %v60_v20 }
  0x17   :  { %604 = vmatpush3.bf16.msra.mxu0 %v603_v63  ;;  %v75_v18 = vld [vmem:[%s1086_s1 + $0x168] sm:$0xff]  ;;  %v93_v24 = vld [vmem:[%s1086_s1 + $0x1f8] sm:$0xff]  ;;  %273 = vmatprep.mubr.f32.mxu1 %v26_v22  ;;  %v611_v25 = vpack.c.bf16 %v43_v16, %v42_v12  ;;  %v44_v28 = vld [vmem:[%s1086_s1 + $0x70] sm:$0xff] }
  0x18   :  { %606 = vmatprep.subr.bf16.mxu0 %v605_v1  ;;  %v643_v26 = vpack.c.bf16 %v75_v18, %v74_v17  ;;  %v45_v29 = vld [vmem:[%s1086_s1 + $0x78] sm:$0xff]  ;;  %v76_v30 = vld [vmem:[%s1086_s1 + $0x170] sm:$0xff]  ;;  %v645_v31 = vpack.c.bf16 %v93_v24, %v92_v23  ;;  %v110_v33 = vld [vmem:[%s1086_s1 + $0x280] sm:$0xff] }
  0x19   :  { %636 = vmatpush3.bf16.msra.mxu1 %v635_v0  ;;  %v77_v32 = vld [vmem:[%s1086_s1 + $0x178] sm:$0xff]  ;;  %v111_v34 = vld [vmem:[%s1086_s1 + $0x288] sm:$0xff]  ;;  %v615_v35 = vpack.c.bf16 %v45_v29, %v44_v28  ;;  %v94_v38 = vld [vmem:[%s1086_s1 + $0x200] sm:$0xff] }
  0x1a   :  { %638 = vmatprep.subr.bf16.mxu1 %v637_v5  ;;  %v647_v36 = vpack.c.bf16 %v77_v32, %v76_v30  ;;  %v649_v37 = vpack.c.bf16 %v111_v34, %v110_v33  ;;  %v95_v39 = vld [vmem:[%s1086_s1 + $0x208] sm:$0xff]  ;;  %v112_v40 = vld [vmem:[%s1086_s1 + $0x290] sm:$0xff]  ;;  %v113_v41 = vld [vmem:[%s1086_s1 + $0x298] sm:$0xff] }
  0x1b   :  { %608 = vmatpush3.bf16.msra.mxu0 %v607_v11  ;;  %v23_v42 = vld [vmem:[%s1085_s0] sm:$0xff]  ;;  %v651_v43 = vpack.c.bf16 %v95_v39, %v94_v38  ;;  %v25_v44 = vld [vmem:[%s1085_s0 + $0x10] sm:$0xff]  ;;  %v653_v46 = vpack.c.bf16 %v113_v41, %v112_v40  ;;  %v97_v47 = vld [vmem:[%s1086_s1 + $0x218] sm:$0xff] }
  0x1c   :  { %610 = vmatprep.subr.bf16.mxu0 %v609_v15  ;;  %v96_v45 = vld [vmem:[%s1086_s1 + $0x210] sm:$0xff]  ;;  %v114_v48 = vld [vmem:[%s1086_s1 + $0x2a0] sm:$0xff]  ;;  %v115_v49 = vld [vmem:[%s1086_s1 + $0x2a8] sm:$0xff] }
  0x1d   :  { %640 = vmatpush3.bf16.msra.mxu1 %v639_v14  ;;  %v28_v50 = vld [vmem:[%s1085_s0 + $0x28] sm:$0xff]  ;;  %v126_v52 = vld [vmem:[%s1086_s1 + $0x300] sm:$0xff] }
  0x1e   :  { %642 = vmatprep.subr.bf16.mxu1 %v641_v19  ;;  %v127_v53 = vld [vmem:[%s1086_s1 + $0x308] sm:$0xff] }
  0x1f   :  { %612 = vmatpush3.bf16.msra.mxu0 %v611_v25  ;;  %v682_v54 = vpack.c.bf16 %v127_v53, %v126_v52 }
  0x20   :  { %614 = vmatprep.subr.bf16.mxu0 %v613_v27 }
  0x21   :  { %644 = vmatpush3.bf16.msra.mxu1 %v643_v26 }
  0x22   :  { %646 = vmatprep.subr.bf16.mxu1 %v645_v31 }
  0x23   :  { %616 = vmatpush3.bf16.msra.mxu0 %v615_v35 }
  0x24   :  { %650 = vmatprep.subr.bf16.mxu0 %v649_v37 }
  0x25   :  { %648 = vmatpush3.bf16.msra.mxu1 %v647_v36 }
  0x26   :  { %681 = vmatprep.subr.bf16.mxu1 %v714_v51  ;;  %204 = vmatmul.mubr.f32.vlgmr.msra.gmra.mrb[0].mxu0 %v23_v42 }
  0x27   :  { %12 = vsyncpa [#allocation4], 0  ;;  %652 = vmatpush3.bf16.msra.mxu0 %v651_v43  ;;  %v655_v55 = vpack.c.bf16 %v97_v47, %v96_v45  ;;  %v657_v56 = vpack.c.bf16 %v115_v49, %v114_v48  ;;  %v98_v57 = vld [vmem:[%s1086_s1 + $0x220] sm:$0xff]  ;;  %v99_v58 = vld [vmem:[%s1086_s1 + $0x228] sm:$0xff]  ;;  %343 = vmatprep.mubr.f32.mxu0 %v28_v50  ;;  %vm715_vm0 = vmmov 0   ;;  %v716_v61 = vmov 0.0  }
  0x28   :  { %274 = vmatmul.mubr.f32.vlgmr.msra.gmra.mrb[0].mxu1 %v25_v44  ;;  %654 = vmatprep.subr.bf16.mxu0 %v653_v46  ;;  %v116_v59 = vld [vmem:[%s1086_s1 + $0x2b0] sm:$0xff]  ;;  %v117_v60 = vld [vmem:[%s1086_s1 + $0x2b8] sm:$0xff]  ;;  %vm135_vm1 = vcmask 130048   ;;  %v659_v63 = vpack.c.bf16 %v99_v58, %v98_v57  ;;  %v118_v3 = vld [vmem:[%s1086_s1 + $0x2c0] sm:$0xff]  ;;  %v717_v29 = vmov 0   ;;  %vm428_vm2 = vcmask 80896  }
  0x29   :  { %683 = vmatpush3.bf16.msra.mxu1 %v682_v54  ;;  %582 = vmatprep.mubr.msk.f32.mxu1 %vm715_vm0, %v716_v61  ;;  %v29_v62 = vld [vmem:[%s1085_s0 + $0x30] sm:$0xff]  ;;  %v661_v0 = vpack.c.bf16 %v117_v60, %v116_v59  ;;  %v101_v2 = vld [vmem:[%s1086_s1 + $0x238] sm:$0xff]  ;;  %v119_v4 = vld [vmem:[%s1086_s1 + $0x2c8] sm:$0xff]  ;;  %v438_v51 = vlaneseq  ;;  %vm451_vm3 = vcmask 57344  }
  0x2a   :  { %v100_v1 = vld [vmem:[%s1086_s1 + $0x230] sm:$0xff]  ;;  %v665_v6 = vpack.c.bf16 %v119_v4, %v118_v3  ;;  %v102_v7 = vld [vmem:[%s1086_s1 + $0x240] sm:$0xff]  ;;  %v103_v8 = vld [vmem:[%s1086_s1 + $0x248] sm:$0xff]  ;;  %689 = vset.pattern.permute.xlu0 %v717_v29 }
  0x2b   :  { %656 = vmatpush3.bf16.msra.mxu0 %v655_v55  ;;  %v663_v5 = vpack.c.bf16 %v101_v2, %v100_v1  ;;  %v120_v9 = vld [vmem:[%s1086_s1 + $0x2d0] sm:$0xff]  ;;  %v121_v10 = vld [vmem:[%s1086_s1 + $0x2d8] sm:$0xff]  ;;  %v667_v11 = vpack.c.bf16 %v103_v8, %v102_v7  ;;  %v122_v15 = vld [vmem:[%s1086_s1 + $0x2e0] sm:$0xff]  ;;  %v439_v52 = vshrl.u32 %v438_v51, 7  ;;  %v445_v55 = vand.u32 127, %v438_v51 }
  0x2c   :  { %658 = vmatprep.subr.bf16.mxu0 %v657_v56  ;;  %583 = vmatmul.mubr.msk.f32.vlgmr.msra.gmra.mrb[2].mxu1 %vm135_vm1, %v29_v62  ;;  %v669_v12 = vpack.c.bf16 %v121_v10, %v120_v9  ;;  %v104_v13 = vld [vmem:[%s1086_s1 + $0x250] sm:$0xff]  ;;  %v105_v14 = vld [vmem:[%s1086_s1 + $0x258] sm:$0xff]  ;;  %v123_v16 = vld [vmem:[%s1086_s1 + $0x2e8] sm:$0xff] }
  0x2d   :  { %v671_v17 = vpack.c.bf16 %v105_v14, %v104_v13  ;;  %v673_v18 = vpack.c.bf16 %v123_v16, %v122_v15  ;;  %v106_v19 = vld [vmem:[%s1086_s1 + $0x260] sm:$0xff]  ;;  %v107_v20 = vld [vmem:[%s1086_s1 + $0x268] sm:$0xff]  ;;  %v124_v21 = vld [vmem:[%s1086_s1 + $0x2f0] sm:$0xff]  ;;  %v440_v54 = vsub.s32 0, %v439_v52  ;;  %v448_v58 = vsub.s32 %v445_v55, %v439_v52 }
  0x2e   :  { %v125_v22 = vld [vmem:[%s1086_s1 + $0x2f8] sm:$0xff]  ;;  %v675_v23 = vpack.c.bf16 %v107_v20, %v106_v19  ;;  %v108_v25 = vld [vmem:[%s1086_s1 + $0x270] sm:$0xff]  ;;  %v27_v28 = vld [vmem:[%s1085_s0 + $0x20] sm:$0xff] }
  0x2f   :  { %660 = vmatpush3.bf16.msra.mxu0 %v659_v63  ;;  %v677_v24 = vpack.c.bf16 %v125_v22, %v124_v21  ;;  %v109_v26 = vld [vmem:[%s1086_s1 + $0x278] sm:$0xff]  ;;  %v467_v31 = vld [vmem:[%s1087_s2] ss:$0 sm:$0xff]  ;;  %s718_s2 = smov [#allocation3]  }
  0x30   :  { %662 = vmatprep.subr.bf16.mxu0 %v661_v0  ;;  %v679_v27 = vpack.c.bf16 %v109_v26, %v108_v25  ;;  %v469_v46 = vld [vmem:[%s1088_s3] ss:$0 sm:$0xff]  ;;  %s459_s24 = sshll.u32 %s718_s2, 4  ;;  %s460_s24 = int_to_ptr.vmem [resolvable:$true] %s459_s24 }
  0x31   :  { %v432_v50 = vld [vmem:[#allocation2] sm:$0x1]  ;;  %s690_s3 = scalar_lea.vmem %s460_s24, 16  ;;  %s694_s25 = scalar_lea.vmem %s460_s24, 32 }
  0x32   :  { %p691_p0 = scmp.ne.s32.totalorder %s460_s24, %s690_s3  ;;  %p695_p1 = scmp.lt.s32.totalorder %s460_s24, %s460_s24 }
  0x33   :  { %664 = vmatpush3.bf16.msra.mxu0 %v663_v5  ;;  %p696_p2 = scmp.lt.s32.totalorder %s694_s25, %s690_s3 }
  0x34   :  { %666 = vmatprep.subr.bf16.mxu0 %v665_v6 }
  0x35   :  { %p697_p3 = por %p696_p2, %p695_p1 }
  0x37   :  { %668 = vmatpush3.bf16.msra.mxu0 %v667_v11  ;;  %p698_p4 = pnand %p697_p3, %p691_p0 }
  0x38   :  { %670 = vmatprep.subr.bf16.mxu0 %v669_v12 }
  0x3b   :  { %672 = vmatpush3.bf16.msra.mxu0 %v671_v17 }
  0x3c   :  { %674 = vmatprep.subr.bf16.mxu0 %v673_v18 }
  0x3f   :  { %676 = vmatpush3.bf16.msra.mxu0 %v675_v23 }
  0x40   :  { %678 = vmatprep.subr.bf16.mxu0 %v677_v24 }
  0x43   :  { %680 = vmatpush3.bf16.msra.mxu0 %v679_v27 }
  0x46   :  { %344 = vmatmul.mubr.f32.vlgmr.msra.gmra.mrb[2].mxu0 %v27_v28 }
  0xf9   :  { %v502_v30 = vpop.f32.mrb[0].mxu0 }
  0xfa   :  { %v503_v32 = vpop.f32.mrb[1].mxu0 }
  0xfb   :  { %v537_v33 = vpop.f32.mrb[0].mxu1  ;;  %v504_v34 = vadd.f32 %v503_v32, %v502_v30 }
  0xfc   :  { %v538_v35 = vpop.f32.mrb[1].mxu1 }
  0xfd   :  { %v539_v36 = vadd.f32 %v538_v35, %v537_v33  ;;  %v206_v37 = vadd.f32 %v504_v34, %v467_v31 }
  0xff   :  { %v276_v38 = vadd.f32 %v539_v36, %v206_v37  ;;  %v415_v39 = vpop.f32.mrb[2].mxu1 }
 0x100   :  { %v584_v40 = vpop.f32.mrb[3].mxu1 }
 0x119   :  { %v572_v41 = vpop.f32.mrb[2].mxu0 }
 0x11a   :  { %v573_v42 = vpop.f32.mrb[3].mxu0 }
 0x11b   :  { %v574_v43 = vadd.f32 %v573_v42, %v572_v41 }
 0x11d   :  { %v346_v44 = vadd.f32 %v574_v43, %v276_v38 }
 0x11f   :  { %v416_v45 = vadd.f32 %v415_v39, %v346_v44 }
 0x121   :  { %v419_v47 = vmax.f32 %v416_v45, 0.0 }
 0x123   :  { %v427_v48 = vmul.f32 %v469_v46, %v419_v47 }
 0x125   :  { %v429_v49 = vsel %vm428_vm2, %v427_v48, 0.0 }
 0x126   :  { %430 = vadd.xlane.f32.xlu0 %v429_v49 }
 0x13c   :  { %435 = vperm.xlu0 %689, %v432_v50  }
 0x1b3   :  { %v431_v53 = vpop.xlane.xlu0 %430 }
 0x1bb   :  { %v436_v56 = vpop.permute.xlu0 %435 }
 0x1bc   :  { %v441_v57 = vrot.slane %v436_v56, %v440_v54 }
 0x1be   :  { %v442_v59 = vadd.f32 %v441_v57, %v431_v53 }
 0x1c0   :  { %v449_v60 = vrot.slane %v442_v59, %v448_v58 }
 0x1c2   :  { %452 = vst.msk [vmem:[#allocation3] sm:$0x1] %vm451_vm3, %v449_v60 }
 0x1c3   :  { %701 = shalt.err (!%p698_p4)
}
 0x1c4   :  { %s702_s28 = scalar_lea.hbm %s1090_s5, 16 }
 0x1c5   :  { %p703_p5 = scmp.ne.s32.totalorder %s1090_s5, %s702_s28  ;;  %p706_p6 = scmp.lt.u32.totalorder %s702_s28, %s1090_s5 }
 0x1c7   :  { %p708_p7 = pnand %p706_p6, %p703_p5 }
 0x1c9   :  { %711 = shalt.err (!%p708_p7)
}
 0x1ca   :  { %462 = dma.vmem_to_hbm [thread:$0]  %s460_s24, 16, %s1090_s5, [#allocation4]  }
 0x1cb   :  { %712 = dma.done.wait [#allocation4], 16  }
 0x1cc   :  { %713 = vsyncadd [#allocation4], 4294967280 }
 0x1cd   :  { %466 = vsyncpa [#allocation4], 1 }

</bundles_post_ra>
